<compile_context>
chip_gen: v7x
topology: tpu7x:2x2x1
jax: 0.10.0
libtpu: 0.0.40
codegen_flags: <defaults>
</compile_context>

<pallas_src>
import functools

import jax
import jax.numpy as jnp
from jax.experimental import pallas as pl
from jax.experimental.pallas import tpu as pltpu


def _round_up(a: int, m: int) -> int:
    return ((a + m - 1) // m) * m


def _cdiv(a: int, b: int) -> int:
    return -(-a // b)


def _channel_pool_kernel(x_ref, o_ref, max_acc, sum_acc, *, c_total, c_block):
    """One grid step: reduce a (Bt, Cc, T) input block over its channel rows.

    Running max / sum live in f32 VMEM scratch so the channel axis can be split
    across the trailing 'arbitrary' grid axis when C is very large.
    """
    c_idx = pl.program_id(2)
    nc = pl.num_programs(2)

    x = x_ref[...]                                   # (Bt, Cc, T), input dtype

    # Mask channel rows past the true channel count (ragged last C chunk only).
    if c_total % c_block != 0:
        row = jax.lax.broadcasted_iota(jnp.int32, x.shape, dimension=1)
        valid = (c_idx * c_block + row) < c_total
        if jnp.issubdtype(x.dtype, jnp.floating):
            lo = jnp.asarray(-jnp.inf, x.dtype)
        else:
            lo = jnp.asarray(jnp.iinfo(x.dtype).min, x.dtype)
        x_for_max = jnp.where(valid, x, lo)
        x_for_sum = jnp.where(valid, x, jnp.zeros((), x.dtype))
    else:
        x_for_max = x
        x_for_sum = x

    # Max in the input dtype (exact for floats); sum accumulated in f32 without
    # materializing an f32 copy of the whole tile.
    chunk_max = jnp.max(x_for_max, axis=1, keepdims=True).astype(jnp.float32)
    chunk_sum = jnp.sum(x_for_sum, axis=1, keepdims=True, dtype=jnp.float32)

    @pl.when(c_idx == 0)
    def _():
        max_acc[...] = chunk_max
        sum_acc[...] = chunk_sum

    @pl.when(c_idx > 0)
    def _():
        max_acc[...] = jnp.maximum(max_acc[...], chunk_max)
        sum_acc[...] = sum_acc[...] + chunk_sum

    @pl.when(c_idx == nc - 1)
    def _():
        inv_c = jnp.float32(1.0 / c_total)           # static scale, no divide
        out = jnp.concatenate([max_acc[...], sum_acc[...] * inv_c], axis=1)
        o_ref[...] = out.astype(o_ref.dtype)         # one unmasked (Bt,2,T) store


def _choose_tiling(B, C, HW, itemsize, max_block_bytes):
    hw_pad128 = _round_up(HW, 128)
    sub = 8 * max(1, 4 // itemsize)        # sublane granularity for this dtype

    # Channel tile: whole channel axis if it fits at the minimum lane tile,
    # otherwise split C into sublane-aligned chunks (reduced via scratch).
    if C * 128 * itemsize <= max_block_bytes:
        c_block = C
    else:
        c_block = max(sub, (max_block_bytes // (128 * itemsize)) // sub * sub)

    # Lane tile: biggest multiple of 128 keeping (c_block x T) under the budget.
    t_budget = (max_block_bytes // max(c_block * itemsize, 1)) // 128 * 128
    t_block = int(max(128, min(hw_pad128, t_budget)))

    # Batch tile: amortize per-grid-step overhead over several images when one
    # lane tile already covers the whole (small) spatial extent.
    if c_block == C and t_block >= hw_pad128:
        b_block = int(max(1, min(B, max_block_bytes // max(C * t_block * itemsize, 1))))
    else:
        b_block = 1

    # Keep >= 2 "parallel" grid steps when possible (v7x has 2 TensorCores).
    if _cdiv(B, b_block) * _cdiv(HW, t_block) < 2:
        if B >= 2:
            b_block = _cdiv(B, 2)
        elif HW > 128 and t_block > 128:
            t_block = max(128, _round_up(_cdiv(t_block, 2), 128))

    return b_block, c_block, t_block


def channel_pool(x, *, max_block_bytes: int = 8 * 1024 * 1024):
    """Pallas ChannelPool: cat(max over C, mean over C) along a new channel axis of 2."""
    B, C, H, W = x.shape
    HW = H * W
    itemsize = jnp.dtype(x.dtype).itemsize

    b_block, c_block, t_block = _choose_tiling(B, C, HW, itemsize, max_block_bytes)
    grid = (_cdiv(B, b_block), _cdiv(HW, t_block), _cdiv(C, c_block))

    # No jnp.pad / output slice: lane-dense flattened spatial axis, ragged
    # trailing blocks handled by Pallas (see kernel for C-axis masking).
    xf = x.reshape(B, C, HW)

    # Explicit scoped-VMEM budget: 2x double-buffered blocks + f32 scratch +
    # headroom for in-kernel intermediates, capped safely under v7x's 64 MiB.
    in_bytes = b_block * c_block * t_block * itemsize
    out_bytes = b_block * 2 * t_block * itemsize
    scratch_bytes = 2 * b_block * t_block * 4
    vmem_limit = int(min(56 * 1024 * 1024,
                         max(32 * 1024 * 1024,
                             3 * in_bytes + 3 * out_bytes + scratch_bytes + (4 << 20))))

    kernel = functools.partial(_channel_pool_kernel, c_total=C, c_block=c_block)

    out = pl.pallas_call(
        kernel,
        out_shape=jax.ShapeDtypeStruct((B, 2, HW), x.dtype),
        grid_spec=pltpu.PrefetchScalarGridSpec(
            num_scalar_prefetch=0,
            grid=grid,
            in_specs=[pl.BlockSpec((b_block, c_block, t_block),
                                   lambda b, t, c: (b, c, t))],
            out_specs=pl.BlockSpec((b_block, 2, t_block),
                                   lambda b, t, c: (b, 0, t)),
            scratch_shapes=[pltpu.VMEM((b_block, 1, t_block), jnp.float32),
                            pltpu.VMEM((b_block, 1, t_block), jnp.float32)],
        ),
        compiler_params=pltpu.CompilerParams(
            dimension_semantics=("parallel", "parallel", "arbitrary"),
            vmem_limit_bytes=vmem_limit,
        ),
    )(xf)

    return out.reshape(B, 2, H, W)


def _reference(x):
    return jnp.concatenate(
        [jnp.max(x, axis=1, keepdims=True), jnp.mean(x, axis=1, keepdims=True)],
        axis=1,
    )


if __name__ == "__main__":
    key = jax.random.PRNGKey(0)

    # Main check: shapes implied by the module.
    B, C, H, W = 2, 4, 16, 16
    x = jax.random.normal(key, (B, C, H, W), dtype=jnp.float32)
    out = jax.block_until_ready(channel_pool(x))
    ref = _reference(x)
    assert out.shape == (B, 2, H, W), out.shape
    assert jnp.allclose(out, ref, atol=1e-5, rtol=1e-5), "mismatch vs reference (f32)"

    # Ragged spatial extent (H*W = 63 < 128): exercises the pad-free ragged
    # lane-tile path (no jnp.pad, no output slice).
    x2 = jax.random.normal(jax.random.PRNGKey(1), (2, 6, 7, 9), dtype=jnp.float32)
    out2 = jax.block_until_ready(channel_pool(x2))
    ref2 = _reference(x2)
    assert out2.shape == (2, 2, 7, 9), out2.shape
    assert jnp.allclose(out2, ref2, atol=1e-5, rtol=1e-5), "mismatch vs reference (ragged HW)"

    # Force the chunked-C (running max/sum scratch) path with a tiny budget,
    # including a ragged last channel chunk (20 channels, 16-row chunks).
    x3 = jax.random.normal(jax.random.PRNGKey(2), (1, 20, 8, 8), dtype=jnp.float32)
    out3 = jax.block_until_ready(channel_pool(x3, max_block_bytes=8 * 1024))
    ref3 = _reference(x3)
    assert out3.shape == (1, 2, 8, 8), out3.shape
    assert jnp.allclose(out3, ref3, atol=1e-5, rtol=1e-5), "mismatch vs reference (C-chunked)"

    print("KERNEL_OK")
</pallas_src>

<mosaic_0001>
module attributes {stable_mosaic.version = 11 : i64} {
  func.func @_channel_pool_kernel(%arg0: i32, %arg1: i32, %arg2: i32, %arg3: memref<1x4x256xf32, #tpu.memory_space<vmem>>, %arg4: memref<1x2x256xf32, #tpu.memory_space<vmem>>, %arg5: memref<1x1x256xf32, #tpu.memory_space<vmem>>, %arg6: memref<1x1x256xf32, #tpu.memory_space<vmem>>) attributes {dimension_semantics = [#tpu.dimension_semantics<parallel>, #tpu.dimension_semantics<parallel>, #tpu.dimension_semantics<arbitrary>], iteration_bounds = array<i64: 2, 1, 1>, scalar_prefetch = 0 : i64, scratch_operands = 2 : i64, tpu.core_type = #tpu.core_type<tc>, window_params = [{transform_indices = @transform_0, window_bounds = array<i64: 1, 4, 256>}, {transform_indices = @transform_1, window_bounds = array<i64: 1, 2, 256>}]} {
    %c0 = arith.constant 0 : index
    %c0_0 = arith.constant 0 : index
    %c0_1 = arith.constant 0 : index
    %0 = vector.load %arg3[%c0, %c0_0, %c0_1] : memref<1x4x256xf32, #tpu.memory_space<vmem>>, vector<1x4x256xf32>
    %cst = arith.constant dense<0xFF800000> : vector<1x256xf32>
    %1 = vector.multi_reduction <maximumf>, %0, %cst [1] : vector<1x4x256xf32> to vector<1x256xf32>
    %2 = vector.shape_cast %1 : vector<1x256xf32> to vector<1x1x256xf32>
    %cst_2 = arith.constant dense<0.000000e+00> : vector<1x256xf32>
    %3 = vector.multi_reduction <add>, %0, %cst_2 [1] : vector<1x4x256xf32> to vector<1x256xf32>
    %4 = vector.shape_cast %3 : vector<1x256xf32> to vector<1x1x256xf32>
    %c0_i32 = arith.constant 0 : i32
    %5 = arith.cmpi eq, %arg2, %c0_i32 : i32
    %6 = arith.extui %5 : i1 to i32
    %c0_i32_3 = arith.constant 0 : i32
    %7 = arith.cmpi ne, %6, %c0_i32_3 : i32
    scf.if %7 {
      %c0_8 = arith.constant 0 : index
      %c0_9 = arith.constant 0 : index
      %c0_10 = arith.constant 0 : index
      %14 = vector.load %arg5[%c0_8, %c0_9, %c0_10] : memref<1x1x256xf32, #tpu.memory_space<vmem>>, vector<1x1x256xf32>
      tpu.vector_store %arg5[%c0_8, %c0_9, %c0_10], %2 {strides = array<i32>} : memref<1x1x256xf32, #tpu.memory_space<vmem>>, vector<1x1x256xf32>,
      %c0_11 = arith.constant 0 : index
      %c0_12 = arith.constant 0 : index
      %c0_13 = arith.constant 0 : index
      %15 = vector.load %arg6[%c0_11, %c0_12, %c0_13] : memref<1x1x256xf32, #tpu.memory_space<vmem>>, vector<1x1x256xf32>
      tpu.vector_store %arg6[%c0_11, %c0_12, %c0_13], %4 {strides = array<i32>} : memref<1x1x256xf32, #tpu.memory_space<vmem>>, vector<1x1x256xf32>,
    } else {
    }
    %c0_i32_4 = arith.constant 0 : i32
    %8 = arith.cmpi sgt, %arg2, %c0_i32_4 : i32
    %9 = arith.extui %8 : i1 to i32
    %c0_i32_5 = arith.constant 0 : i32
    %10 = arith.cmpi ne, %9, %c0_i32_5 : i32
    scf.if %10 {
      %c0_8 = arith.constant 0 : index
      %c0_9 = arith.constant 0 : index
      %c0_10 = arith.constant 0 : index
      %14 = vector.load %arg5[%c0_8, %c0_9, %c0_10] : memref<1x1x256xf32, #tpu.memory_space<vmem>>, vector<1x1x256xf32>
      %15 = arith.maximumf %14, %2 : vector<1x1x256xf32>
      %c0_11 = arith.constant 0 : index
      %c0_12 = arith.constant 0 : index
      %c0_13 = arith.constant 0 : index
      %16 = vector.load %arg5[%c0_11, %c0_12, %c0_13] : memref<1x1x256xf32, #tpu.memory_space<vmem>>, vector<1x1x256xf32>
      tpu.vector_store %arg5[%c0_11, %c0_12, %c0_13], %15 {strides = array<i32>} : memref<1x1x256xf32, #tpu.memory_space<vmem>>, vector<1x1x256xf32>,
      %c0_14 = arith.constant 0 : index
      %c0_15 = arith.constant 0 : index
      %c0_16 = arith.constant 0 : index
      %17 = vector.load %arg6[%c0_14, %c0_15, %c0_16] : memref<1x1x256xf32, #tpu.memory_space<vmem>>, vector<1x1x256xf32>
      %18 = arith.addf %17, %4 : vector<1x1x256xf32>
      %c0_17 = arith.constant 0 : index
      %c0_18 = arith.constant 0 : index
      %c0_19 = arith.constant 0 : index
      %19 = vector.load %arg6[%c0_17, %c0_18, %c0_19] : memref<1x1x256xf32, #tpu.memory_space<vmem>>, vector<1x1x256xf32>
      tpu.vector_store %arg6[%c0_17, %c0_18, %c0_19], %18 {strides = array<i32>} : memref<1x1x256xf32, #tpu.memory_space<vmem>>, vector<1x1x256xf32>,
    } else {
    }
    %c0_i32_6 = arith.constant 0 : i32
    %11 = arith.cmpi eq, %arg2, %c0_i32_6 : i32
    %12 = arith.extui %11 : i1 to i32
    %c0_i32_7 = arith.constant 0 : i32
    %13 = arith.cmpi ne, %12, %c0_i32_7 : i32
    scf.if %13 {
      %c0_8 = arith.constant 0 : index
      %c0_9 = arith.constant 0 : index
      %c0_10 = arith.constant 0 : index
      %14 = vector.load %arg5[%c0_8, %c0_9, %c0_10] : memref<1x1x256xf32, #tpu.memory_space<vmem>>, vector<1x1x256xf32>
      %c0_11 = arith.constant 0 : index
      %c0_12 = arith.constant 0 : index
      %c0_13 = arith.constant 0 : index
      %15 = vector.load %arg6[%c0_11, %c0_12, %c0_13] : memref<1x1x256xf32, #tpu.memory_space<vmem>>, vector<1x1x256xf32>
      %cst_14 = arith.constant 2.500000e-01 : f32
      %16 = vector.broadcast %cst_14 : f32 to vector<1x1x256xf32>
      %17 = arith.mulf %15, %16 : vector<1x1x256xf32>
      %18 = tpu.concatenate %14, %17 in 1 : vector<1x1x256xf32>, vector<1x1x256xf32> -> vector<1x2x256xf32>
      %c0_15 = arith.constant 0 : index
      %c0_16 = arith.constant 0 : index
      %c0_17 = arith.constant 0 : index
      %19 = vector.load %arg4[%c0_15, %c0_16, %c0_17] : memref<1x2x256xf32, #tpu.memory_space<vmem>>, vector<1x2x256xf32>
      tpu.vector_store %arg4[%c0_15, %c0_16, %c0_17], %18 {strides = array<i32>} : memref<1x2x256xf32, #tpu.memory_space<vmem>>, vector<1x2x256xf32>,
    } else {
    }
    return
  }
  func.func @transform_0(%arg0: i32, %arg1: i32, %arg2: i32) -> (i32, i32, i32) {
    %c0_i32 = arith.constant 0 : i32
    return %arg0, %arg2, %arg1 : i32, i32, i32
  }
  func.func @transform_1(%arg0: i32, %arg1: i32, %arg2: i32) -> (i32, i32, i32) {
    %c0_i32 = arith.constant 0 : i32
    %c0_i32_0 = arith.constant 0 : i32
    return %arg0, %c0_i32, %arg1 : i32, i32, i32
  }
}

</mosaic_0001>

<bundles_post_ra>
// kernel: tpu_custom_call.1
= control target key start
LH: loop header
LB: loop body
LE: loop exit
PB: predicated region body
PF: predicated region fallthrough
CT: control target
= control target key end

     0   :  { %6 = vsyncpa [#allocation5], 0  ;;  %s824_s0 = inlined_call_operand.hbm [shape: f32[2,4,256], index: 0, kind: input, shape index: {}]   ;;  %s825_s1 = inlined_call_operand.hbm [shape: f32[2,2,256], index: 1, kind: output, shape index: {}]  }
   0x1   :  { %8 = vsyncpa [#allocation5 + $0x1], 0 }
   0x2   :  { %9 = vsyncpa [#allocation6], 0 }
   0x3   :  { %11 = vsyncpa [#allocation6 + $0x1], 0  ;;  %s651_s6 = smov 0   ;;  %s653_s7 = smov 0  }
   0x4   :  { %s655_s8 = smov 0   ;;  %s657_s9 = smov 0  }
   0x5   :  { %s659_s10 = smov 0   ;;  %s661_s11 = smov 0  }
   0x6 LB: > { %s442_s12 = sadd.s32 4294967295, %s636_s11   ;;  %s443_s13 = sadd.s32 4294967294, %s636_s11   ;;  %s636_s11 = sphi %s661_s11, %s17_s11   ;;  %s632_s10 = sphi %s659_s10, %s841_s10   ;;  %s628_s9 = sphi %s657_s9, %s840_s9   ;;  %s624_s8 = sphi %s655_s8, %s839_s8   ;;  %s620_s7 = sphi %s653_s7, %s838_s7   ;;  %s616_s6 = sphi %s651_s6, %s837_s6  }
   0x7   : > { %s36_s14 = sadd.s32 1, %s632_s10  ;;  %s47_s15 = sadd.s32 1, %s624_s8 }
   0x8   : > { %p38_p0 = scmp.ge.s32.totalorder %s36_s14, 2  ;;  %p54_p1 = scmp.ne.s32.totalorder %s624_s8, %s620_s7 }
   0x9   : > { %p55_p2 = scmp.eq.s32.totalorder %s636_s11, 0  ;;  %p60_p3 = scmp.ne.s32.totalorder %s620_s7, %s616_s6 }
   0xa   : > { %s843_s14 = smov (%p38_p0, %s36_s14), 0  ;;  %p61_p5 = scmp.eq.s32.totalorder %s442_s12, 0 }
   0xb   : > { %p692_p4 = por %p55_p2, %p54_p1  ;;  %s40_s17 = ssub.s32 %s632_s10, %s843_s14 }
   0xc   : > { %p86_p6 = scmp.eq.s32.totalorder %s442_s12, 1  ;;  %p45_p7 = scmp.eq.s32.totalorder %s40_s17, 0 }
   0xd   : > { %p698_p8 = por %p61_p5, %p60_p3  ;;  %p92_p10 = scmp.eq.s32.totalorder %s443_s13, 1 }
   0xe   : > { %p702_p9 = por %p86_p6, %p54_p1  ;;  %p472_p13 = scmp.lt.s32.totalorder %s636_s11, 2 }
   0xf   : > { %s707_s20 = scalar_select %p45_p7, %s624_s8, %s47_s15  }
  0x10   : > { %s829_s19 = scalar_select %p702_p9, 1, 0 }
  0x11   : > { %p709_p11 = por %p92_p10, %p60_p3  ;;  %s112_s22 = sand.u32 1, %s624_s8  }
  0x12   : > { %s446_s23 = sshll.u32 %s112_s22, 3  ;;  %s458_s24 = sshll.u32 %s632_s10, 7 }
  0x13   : > { %s830_s21 = scalar_select %p709_p11, 1, 0 }
  0x14   : > { %s720_s27 = scalar_lea.hbm %s824_s0, %s458_s24  ;;  %s116_s28 = scalar_lea.vmem [#allocation4], %s446_s23 }
  0x15   : > { %s128_s29 = sshll.u32 %s116_s28, 4  ;;  %p726_p0 = pnand %p472_p13, %p692_p4  ;;  %s722_s29 = int_to_ptr.vmem [resolvable:$true] %s128_s29 }
  0x16   : > { %s113_s2 = scalar_lea.sflag [#allocation5], %s112_s22  ;;  %s524_s3 = scalar_lea.hbm %s720_s27, 128 }
  0x17   : > { %p525_p3 = scmp.ne.s32.totalorder %s720_s27, %s524_s3  ;;  %p526_p5 = pneg %p726_p0 }
  0x18   : > { %s529_s12 = scalar_lea.hbm %s824_s0, 256  ;;  %p530_p4 = scmp.lt.u32.totalorder %s720_s27, %s824_s0 }
  0x19   : > { %p527_p6 = pnand %p526_p5, %p525_p3  ;;  %p531_p10 = scmp.lt.u32.totalorder %s529_s12, %s524_s3 }
  0x1a   : > { %p533_p12 = scmp.lt.u32.totalorder %s524_s3, %s720_s27 }
  0x1b   : > { %p528_p7 = pneg %p527_p6  ;;  %p532_p13 = por %p531_p10, %p530_p4 }
  0x1d   : > { %p534_p1 = por %p533_p12, %p532_p13 }
  0x1f   : > { %p535_p2 = pnand %p534_p1, %p528_p7 }
  0x21   : > { %538 = shalt.err (!%p535_p2)
}
  0x22   : > { %s539_s16 = scalar_lea.vmem %s722_s29, 128  ;;  %s638_s17 = smov [#allocation4]  }
  0x23   : > { %p540_p3 = scmp.ne.s32.totalorder %s722_s29, %s539_s16  ;;  %s544_s22 = sshll.u32 %s638_s17, 4  ;;  %s545_s22 = int_to_ptr.vmem [resolvable:$false] %s544_s22 }
  0x24   : > { %s546_s23 = scalar_lea.vmem %s545_s22, 256  ;;  %p547_p9 = scmp.lt.s32.totalorder %s722_s29, %s545_s22 }
  0x25   : > { %p542_p6 = pnand %p540_p3, %p526_p5  ;;  %p548_p4 = scmp.lt.s32.totalorder %s546_s23, %s539_s16 }
  0x27   : > { %p543_p11 = pneg %p542_p6  ;;  %p549_p10 = por %p548_p4, %p547_p9 }
  0x29   : > { %p550_p12 = pnand %p549_p10, %p543_p11 }
  0x2b   : > { %553 = shalt.err (!%p550_p12)
}
  0x2c   : > { %467 = dma.hbm_to_vmem [thread:$0]  (!%p726_p0), %s720_s27, 128, %s722_s29, %s113_s2  }
  0x2d   : > { %p832_p1 = scmp.lt.s32.totalorder %s636_s11, 3  ;;  %p833_p2 = scmp.ge.s32.totalorder %s636_s11, 1 }
  0x2f   : > { %p134_p5 = pnand %p833_p2, %p832_p1 }
  0x30   : > { %s762_s24 = sand.u32 (!%p134_p5), 1, %s620_s7  }
  0x31   : > { %137 = sbr.rel (%p134_p5) target bundleno = 108 (0x6c), region = 24  ;;  %s450_s25 = sshll.u32 (!%p134_p5), %s762_s24, 3 }
  0x32   : > { %s140_s26 = scalar_lea.sflag (!%p134_p5), [#allocation5], %s762_s24  ;;  %s143_s28 = scalar_lea.vmem (!%p134_p5), [#allocation4], %s450_s25 }
  0x38   : > { %607 = dma.done.wait (%p698_p8), %s140_s26, 128  }
  0x39   : > { %609 = vsyncadd (%p698_p8), %s140_s26, 4294967168  ;;  %vm168_vm0 = vcmask 1043456   ;;  %v164_v0 = vld [vmem:[%s143_s28] sm:$0xff]  ;;  %v639_v12 = vmov 1966171168   ;;  %v207_v14 = vlaneseq  ;;  %s451_s18 = sshll.u32 %s762_s24, 2 }
  0x3a   : > { %v166_v1 = vcombine.high %v164_v0, %v164_v0  ;;  %v183_v2 = vsel %vm168_vm0, %v164_v0, 0.0  ;;  %v169_v3 = vsel %vm168_vm0, %v164_v0, -inf  ;;  %v205_v13 = vunpack.c.l.s4 %v639_v12  ;;  %s161_s27 = scalar_lea.vmem [#allocation7], %s451_s18  ;;  %s459_s30 = sshll.u32 %s628_s9, 6 }
  0x3b   : > { %v184_v4 = vrot.slane %v183_v2, 4  ;;  %v170_v5 = vrot.slane %v169_v3, 4  ;;  %v208_v24 = vshrl.u32 %v207_v14, 7  ;;  %vm221_vm1 = vcmp.lt.s32.totalorder %v207_v14, 256  ;;  %s353_s29 = sshll.u32 %s161_s27, 4  ;;  %s777_s4 = scalar_lea.hbm %s825_s1, %s459_s30  ;;  %s772_s29 = int_to_ptr.vmem [resolvable:$true] %s353_s29 }
  0x3c   : > { %v190_v6 = vsel %vm168_vm0, %v166_v1, 0.0  ;;  %v176_v7 = vsel %vm168_vm0, %v166_v1, -inf  ;;  %v206_v23 = vunpack.c.0.s8 %v205_v13  ;;  %vm321_vm2 = vcmask 1040384   ;;  %s337_s5 = scalar_lea.sflag [#allocation6], %s762_s24  ;;  %s554_s12 = scalar_lea.vmem %s772_s29, 64 }
  0x3d   : > { %v185_v8 = vadd.f32 %v184_v4, %v183_v2  ;;  %v191_v9 = vrot.slane %v190_v6, 4  ;;  %v171_v10 = vmax.f32 %v169_v3, %v170_v5  ;;  %v177_v11 = vrot.slane %v176_v7, 4  ;;  %p555_p8 = scmp.ne.s32.totalorder %s772_s29, %s554_s12  ;;  %p834_p9 = scmp.ne.s32.totalorder %s829_s19, 0 }
  0x3e   : > { %v209_v34 = vsub.s32 %v206_v23, %v208_v24  ;;  %v302_v42 = vsub.s32 0, %v208_v24  ;;  %v306_v43 = vsub.s32 1, %v208_v24  ;;  %s640_s9 = smov [#allocation7]  }
  0x3f   : > { %v186_v15 = vrot.slane %v185_v8, 2  ;;  %v192_v16 = vadd.f32 %v191_v9, %v190_v6  ;;  %v172_v17 = vrot.slane %v171_v10, 2  ;;  %v178_v18 = vmax.f32 %v176_v7, %v177_v11  ;;  %p556_p11 = pnand %p555_p8, %p834_p9  ;;  %s558_s13 = sshll.u32 %s640_s9, 4  ;;  %s559_s13 = int_to_ptr.vmem [resolvable:$false] %s558_s13 }
  0x40   : > { %s560_s15 = scalar_lea.vmem %s559_s13, 128  ;;  %p561_p7 = scmp.lt.s32.totalorder %s772_s29, %s559_s13 }
  0x41   : > { %v187_v19 = vadd.f32 %v186_v15, %v185_v8  ;;  %v193_v20 = vrot.slane %v192_v16, 2  ;;  %v173_v21 = vmax.f32 %v171_v10, %v172_v17  ;;  %v179_v22 = vrot.slane %v178_v18, 2  ;;  %p557_p0 = pneg %p556_p11  ;;  %p562_p13 = scmp.lt.s32.totalorder %s560_s15, %s554_s12 }
  0x43   : > { %v188_v25 = vrot.slane %v187_v19, 1  ;;  %v194_v26 = vadd.f32 %v193_v20, %v192_v16  ;;  %v174_v27 = vrot.slane %v173_v21, 1  ;;  %v180_v28 = vmax.f32 %v178_v18, %v179_v22  ;;  %p563_p3 = por %p562_p13, %p561_p7 }
  0x45   : > { %v189_v29 = vadd.f32 %v188_v25, %v187_v19  ;;  %v195_v30 = vrot.slane %v194_v26, 1  ;;  %v175_v31 = vmax.f32 %v173_v21, %v174_v27  ;;  %v181_v32 = vrot.slane %v180_v28, 1  ;;  %p564_p6 = pnand %p563_p3, %p557_p0 }
  0x47   : > { %v196_v33 = vadd.f32 %v195_v30, %v194_v26  ;;  %v182_v35 = vmax.f32 %v180_v28, %v181_v32 }
  0x49   : > { %v226_v36 = vcombine.low %v189_v29, %v196_v33  ;;  %v203_v37 = vcombine.low %v175_v31, %v182_v35 }
  0x4b   : > { %v233_v38 = vrot.slane %v226_v36, %v209_v34  ;;  %v210_v39 = vrot.slane %v203_v37, %v209_v34 }
  0x4d   : > { %v240_v40 = vrot.slane %v233_v38, %v209_v34  ;;  %v217_v41 = vrot.slane %v210_v39, %v209_v34 }
  0x4f   : > { %242 = vst.msk [vmem:[#allocation3] sm:$0x3] %vm221_vm1, %v240_v40  ;;  %223 = vst.msk [vmem:[#allocation2] sm:$0x3] %vm221_vm1, %v217_v41 }
  0x56   : > { %v296_v44 = vld [vmem:[#allocation2] sm:$0x3]  ;;  %v297_v45 = vld [vmem:[#allocation3] sm:$0x3] }
  0x57   : > { %v298_v46 = vmul.f32 0.25, %v297_v45  ;;  %v303_v47 = vrot.slane %v296_v44, %v302_v42  ;;  %v307_v48 = vrot.slane %v296_v44, %v306_v43 }
  0x59   : > { %v314_v49 = vrot.slane %v298_v46, %v302_v42  ;;  %v318_v50 = vrot.slane %v298_v46, %v306_v43 }
  0x5b   : > { %v322_v51 = vsel %vm321_vm2, %v303_v47, %v314_v49  ;;  %v323_v52 = vsel %vm321_vm2, %v307_v48, %v318_v50 }
  0x5c   : > { %v326_v53 = vcombine.low %v322_v51, %v323_v52 }
  0x5e   : > { %452 = vst.sshfl [vmem:[%s161_s27] sm:$0x33 pattern:$0x76325410] %v326_v53 }
  0x5f   : > { %567 = shalt.err (!%p564_p6)
}
  0x60   : > { %s568_s16 = scalar_lea.hbm %s777_s4, 64  ;;  %s572_s23 = scalar_lea.hbm %s825_s1, 128 }
  0x61   : > { %p569_p4 = scmp.ne.s32.totalorder %s777_s4, %s568_s16  ;;  %p573_p1 = scmp.lt.u32.totalorder %s777_s4, %s825_s1 }
  0x62   : > { %p574_p2 = scmp.lt.u32.totalorder %s572_s23, %s568_s16  ;;  %p576_p8 = scmp.lt.u32.totalorder %s568_s16, %s777_s4 }
  0x63   : > { %p570_p10 = pnand %p569_p4, %p834_p9 }
  0x64   : > { %p575_p5 = por %p574_p2, %p573_p1 }
  0x65   : > { %p571_p12 = pneg %p570_p10 }
  0x66   : > { %p577_p11 = por %p576_p8, %p575_p5 }
  0x68   : > { %p578_p0 = pnand %p577_p11, %p571_p12 }
  0x6a   : > { %581 = shalt.err (!%p578_p0)
}
  0x6b   : > { %462 = dma.vmem_to_hbm [thread:$0]  (%p834_p9), %s772_s29, 64, %s777_s4, %s337_s5  }
  0x6c PF: > { %s365_s26 = sand.u32 1, %s616_s6   ;;  %p835_p7 = scmp.ne.s32.totalorder %s830_s21, 0 }
  0x6d   : > { %p836_p13 = scmp.ge.s32.totalorder %s636_s11, 2  ;;  %s366_s28 = scalar_lea.sflag [#allocation6], %s365_s26 }
  0x6f   : > { %p469_p3 = pnand %p836_p13, %p835_p7 }
  0x71   : > { %611 = dma.done.wait (!%p469_p3), %s366_s28, 64  }
  0x72   : > { %613 = vsyncadd (!%p469_p3), %s366_s28, 4294967232  ;;  %s17_s11 = sadd.s32 1, %s636_s11   ;;  %s837_s6 = smov %s620_s7 }
  0x73   : > { %p14_p6 = scmp.ge.s32.totalorder %s17_s11, 4   ;;  %s838_s7 = smov %s624_s8 }
  0x74   : > { %s839_s8 = smov %s707_s20  ;;  %s840_s9 = smov %s632_s10 }
  0x75   : > { %s841_s10 = smov %s843_s14  ;;  %16 = sbr.rel (!%p14_p6) target bundleno = 6 (0x6), region = 81 }
  0x7c   :  { %371 = vsyncpa [#allocation5], 1 }
  0x7d   :  { %373 = vsyncpa [#allocation5 + $0x1], 1 }
  0x7e   :  { %374 = vsyncpa [#allocation6], 1 }
  0x7f   :  { %376 = vsyncpa [#allocation6 + $0x1], 1 }

</bundles_post_ra>
